<compile_context>
chip_gen: v6e
topology: v6e:2x2x1
jax: 0.10.0
libtpu: 0.0.40
codegen_flags: <defaults>
</compile_context>

<pallas_src>
import jax
import jax.numpy as jnp
from jax.experimental import pallas as pl
from jax.experimental.pallas import tpu as pltpu


def _cdiv(a, b):
    return (a + b - 1) // b


def _round_up(a, b):
    return _cdiv(a, b) * b


def _default_block_budget_bytes():
    """Per-step VMEM budget for the (double-buffered) blocks.

    VMEM differs per generation (v7x: 64 MiB, v5e/v6e: 128 MiB); keep the
    per-step block footprint comfortably below the scoped limit on all of them.
    """
    try:
        vmem = int(getattr(pltpu.get_tpu_info(), "vmem_capacity_bytes", 0))
        if vmem > 0:
            return int(min(max(vmem // 6, 8 * 2**20), 24 * 2**20))
    except Exception:
        pass
    return 12 * 2**20


# ---------------------------------------------------------------------------
# Kernel bodies
# ---------------------------------------------------------------------------
def _logits(enc_ref, w_ref):
    """attn[b,0,s] = <w, e[b,s,:]> — batched MXU matmul with a length-1 query."""
    e = enc_ref[...]                                   # (TB, S, D), native dtype
    tb, _, d = e.shape
    wq = jnp.broadcast_to(w_ref[...], (tb, 1, d))      # (TB, 1, D)
    attn = jnp.einsum("bqd,bkd->bqk", wq, e,
                      preferred_element_type=jnp.float32)   # (TB, 1, S) f32
    return e, attn


def _softmax_pool(e, attn, out_ref, *, fix_all_masked):
    """Softmax of attn (TB,1,S) over the lane (seq) axis, then MXU-pooled sum."""
    mx = jnp.max(attn, axis=-1, keepdims=True)         # (TB, 1, 1)
    if fix_all_masked:
        # Rows where every position is masked have mx == -inf; PyTorch resets
        # their logits to 0 => uniform softmax over S.
        bad = mx == -jnp.inf
        attn = jnp.where(bad, 0.0, attn)
        mx = jnp.where(bad, 0.0, mx)
    p = jnp.exp(attn - mx)                             # (TB, 1, S) f32
    s = jnp.sum(p, axis=-1, keepdims=True)             # (TB, 1, 1)
    score = p * pl.reciprocal(s, approx=True)          # (TB, 1, S) f32 (EUP)
    # out[b,0,d] = sum_s score[b,0,s] * e[b,s,d] — batched MXU matmul with
    # f32 accumulation; score is cast to e's dtype (flash-attention style).
    out = jnp.einsum("bqk,bkd->bqd", score.astype(e.dtype), e,
                     preferred_element_type=jnp.float32)     # (TB, 1, D) f32
    out_ref[...] = out.astype(out_ref.dtype)


def sla_kernel_masked(enc_ref, w_ref, mask_ref, out_ref):
    e, attn = _logits(enc_ref, w_ref)
    m = mask_ref[...].astype(jnp.float32)              # (TB, 1, S), from int8
    attn = jnp.where(m != 0.0, -jnp.inf, attn)
    _softmax_pool(e, attn, out_ref, fix_all_masked=True)


def sla_kernel_nomask(enc_ref, w_ref, out_ref):
    e, attn = _logits(enc_ref, w_ref)
    _softmax_pool(e, attn, out_ref, fix_all_masked=False)


# ---------------------------------------------------------------------------
# Wrapper
# ---------------------------------------------------------------------------
def sla_forward(encoding, weight, bias=None, mask=None, *, block_b=None,
                vmem_block_budget_bytes=None, target_grid_steps=8):
    """encoding: (B, S, D) f32/bf16; weight: Linear(D,1) weight (D elements);
    bias: ignored (softmax over the seq axis is shift-invariant, so the bias
    provably never changes score or output); mask: (B, S) bool/int
    (nonzero == masked out) or None.  Returns (B, D) f32."""
    del bias  # shift-invariance of softmax over the seq axis
    B, S, D = encoding.shape
    isz = jnp.dtype(encoding.dtype).itemsize
    use_mask = mask is not None

    # --- tile sizing from the real (double-buffered) VMEM footprint --------
    if vmem_block_budget_bytes is None:
        vmem_block_budget_bytes = _default_block_budget_bytes()
    per_row = (2 * S * D * isz                  # encoding block, double-buffered
               + 2 * D * 4                      # output block, double-buffered (f32)
               + (2 * S if use_mask else 0)     # int8 mask block, double-buffered
               + 4 * S * 4                      # attn/p/score f32 intermediates
               + D * isz + D * 4)               # broadcast weight + f32 pooled temp
    if block_b is not None:
        tb = min(block_b, B)
        if tb < B:
            tb = max(8, (tb // 8) * 8)
    elif B <= 8:
        tb = B
    else:
        tb = max(8, (vmem_block_budget_bytes // per_row) // 8 * 8)
        # Keep >= ~target_grid_steps grid steps: v7x megacore sharding and
        # DMA/compute overlap need more than one step.
        tb = min(tb, _round_up(_cdiv(B, target_grid_steps), 8))
        tb = min(tb, _round_up(B, 8))
    grid = (_cdiv(B, tb),)

    footprint = tb * per_row + 4 * D * isz + (1 << 16)
    vmem_limit = int(min(max(footprint * 3 // 2, 8 * 2**20), 48 * 2**20))

    # --- operands (no jnp.pad pre-pass; ragged last block handled by Pallas)
    w = jnp.asarray(weight).reshape(1, 1, D).astype(encoding.dtype)
    in_specs = [
        pl.BlockSpec((tb, S, D), lambda i: (i, 0, 0)),          # encoding tile
        pl.BlockSpec((1, 1, D), lambda i: (0, 0, 0)),           # Linear(D,1) weight
    ]
    args = [encoding, w]
    if use_mask:
        mask_i8 = jnp.asarray(mask).astype(jnp.int8).reshape(B, 1, S)
        in_specs.append(pl.BlockSpec((tb, 1, S), lambda i: (i, 0, 0)))
        args.append(mask_i8)
        kernel = sla_kernel_masked
    else:
        kernel = sla_kernel_nomask

    out = pl.pallas_call(
        kernel,
        out_shape=jax.ShapeDtypeStruct((B, 1, D), jnp.float32),
        grid_spec=pltpu.PrefetchScalarGridSpec(
            num_scalar_prefetch=0,
            grid=grid,
            in_specs=in_specs,
            out_specs=pl.BlockSpec((tb, 1, D), lambda i: (i, 0, 0)),
        ),
        compiler_params=pltpu.CompilerParams(
            dimension_semantics=("parallel",),
            vmem_limit_bytes=vmem_limit,
        ),
    )(*args)
    return out.reshape(B, D)


# ---------------------------------------------------------------------------
# Plain-JAX reference
# ---------------------------------------------------------------------------
def sla_ref(enc, weight, bias, mask=None):
    enc = enc.astype(jnp.float32)
    wv = jnp.asarray(weight).reshape(-1).astype(jnp.float32)
    attn = jnp.einsum("bsd,d->bs", enc, wv,
                      precision=jax.lax.Precision.HIGHEST)[..., None]
    attn = attn + jnp.asarray(bias).astype(jnp.float32)
    if mask is not None:
        attn = jnp.where(mask[..., None], -jnp.inf, attn)
        aux = jnp.all(attn == -jnp.inf, axis=1, keepdims=True)
        attn = jnp.where(aux, 0.0, attn)
    score = jax.nn.softmax(attn, axis=1)                               # (B, S, 1)
    return jnp.einsum("bso,bsd->bd", score, enc,
                      precision=jax.lax.Precision.HIGHEST)             # (B, D)


if __name__ == "__main__":
    key = jax.random.PRNGKey(0)
    k1, k2, k3, k4 = jax.random.split(key, 4)
    B, S, D = 20, 16, 128                         # small; D lane-dense

    enc = jax.random.normal(k1, (B, S, D), jnp.float32)
    weight = 0.1 * jax.random.normal(k2, (1, D), jnp.float32)   # nn.Linear(D, 1).weight
    bias = 0.1 * jax.random.normal(k3, (1,), jnp.float32)       # nn.Linear(D, 1).bias
    mask = jax.random.bernoulli(k4, 0.3, (B, S))                # True = masked out
    mask = mask.at[1].set(True)                                 # exercise all-masked fix

    # Masked path: block_b=8 -> grid of 3 steps with a ragged last block (no pads).
    out_masked = sla_forward(enc, weight, bias, mask, block_b=8)
    # No-mask path with default tile sizing.
    out_nomask = sla_forward(enc, weight, bias, None)
    # Tiny-batch path (tb == B < 8).
    out_small = sla_forward(enc[:3], weight, bias, mask[:3])
    jax.block_until_ready((out_masked, out_nomask, out_small))

    ref_masked = sla_ref(enc, weight, bias, mask)
    ref_nomask = sla_ref(enc, weight, bias, None)
    assert out_masked.shape == (B, D) and out_nomask.shape == (B, D)
    # MXU matmuls on f32 operands may use default (bf16-pass) precision,
    # hence the 1e-2 tolerance against the HIGHEST-precision reference.
    assert jnp.allclose(out_masked, ref_masked, atol=1e-2, rtol=1e-2)
    assert jnp.allclose(out_nomask, ref_nomask, atol=1e-2, rtol=1e-2)
    assert jnp.allclose(out_small, ref_masked[:3], atol=1e-2, rtol=1e-2)

    # bf16 encoding path: native-dtype DMA + bf16 MXU compute, f32 accumulation.
    enc_bf16 = enc.astype(jnp.bfloat16)
    out_bf16 = sla_forward(enc_bf16, weight, bias, mask)
    jax.block_until_ready(out_bf16)
    w_q = weight.astype(jnp.bfloat16).astype(jnp.float32)   # kernel casts w to enc dtype
    ref_bf16 = sla_ref(enc_bf16.astype(jnp.float32), w_q, bias, mask)
    assert jnp.allclose(out_bf16, ref_bf16, atol=2e-2, rtol=2e-2)

    print("KERNEL_OK")
</pallas_src>

<mosaic_0001>
module attributes {stable_mosaic.version = 11 : i64} {
  func.func @sla_kernel_masked(%arg0: i32, %arg1: memref<8x16x128xf32, #tpu.memory_space<vmem>>, %arg2: memref<1x1x128xf32, #tpu.memory_space<vmem>>, %arg3: memref<8x1x16xi8, #tpu.memory_space<vmem>>, %arg4: memref<8x1x128xf32, #tpu.memory_space<vmem>>) attributes {dimension_semantics = [#tpu.dimension_semantics<parallel>], iteration_bounds = array<i64: 3>, scalar_prefetch = 0 : i64, scratch_operands = 0 : i64, tpu.core_type = #tpu.core_type<tc>, window_params = [{transform_indices = @transform_0, window_bounds = array<i64: 8, 16, 128>}, {pipeline_mode = #tpu.pipeline_mode<synchronous>, transform_indices = @transform_1, window_bounds = array<i64: 1, 1, 128>}, {transform_indices = @transform_2, window_bounds = array<i64: 8, 1, 16>}, {transform_indices = @transform_3, window_bounds = array<i64: 8, 1, 128>}]} {
    %c0 = arith.constant 0 : index
    %c0_0 = arith.constant 0 : index
    %c0_1 = arith.constant 0 : index
    %0 = vector.load %arg1[%c0, %c0_0, %c0_1] : memref<8x16x128xf32, #tpu.memory_space<vmem>>, vector<8x16x128xf32>
    %c0_2 = arith.constant 0 : index
    %c0_3 = arith.constant 0 : index
    %c0_4 = arith.constant 0 : index
    %1 = vector.load %arg2[%c0_2, %c0_3, %c0_4] : memref<1x1x128xf32, #tpu.memory_space<vmem>>, vector<1x1x128xf32>
    %2 = vector.shape_cast %1 : vector<1x1x128xf32> to vector<1x1x128xf32>
    %3 = vector.broadcast %2 : vector<1x1x128xf32> to vector<8x1x128xf32>
    "tpu.trace_start"() <{level = 10 : i32, message = "bqd,bkd->bqk"}> : () -> ()
    %cst = arith.constant dense<0.000000e+00> : vector<8x1x16xf32>
    %4 = tpu.matmul %3, %0, %cst {dimension_numbers = #tpu.dot_dimension_numbers<[2], [2], [1], [1], [0, 0, 0, 1, 1, 1], [0], [0]>} : vector<8x1x128xf32>, vector<8x16x128xf32>, vector<8x1x16xf32> -> vector<8x1x16xf32>
    "tpu.trace_stop"() : () -> ()
    %c0_5 = arith.constant 0 : index
    %c0_6 = arith.constant 0 : index
    %c0_7 = arith.constant 0 : index
    %5 = vector.load %arg3[%c0_5, %c0_6, %c0_7] : memref<8x1x16xi8, #tpu.memory_space<vmem>>, vector<8x1x16xi8>
    %6 = arith.sitofp %5 : vector<8x1x16xi8> to vector<8x1x16xf32>
    %cst_8 = arith.constant 0.000000e+00 : f32
    %7 = vector.broadcast %cst_8 : f32 to vector<8x1x16xf32>
    %8 = arith.cmpf one, %6, %7 : vector<8x1x16xf32>
    %cst_9 = arith.constant 0xFF800000 : f32
    %9 = vector.broadcast %cst_9 : f32 to vector<8x1x16xf32>
    %10 = arith.select %8, %9, %4 : vector<8x1x16xi1>, vector<8x1x16xf32>
    %cst_10 = arith.constant dense<0xFF800000> : vector<8x1xf32>
    %11 = vector.multi_reduction <maximumf>, %10, %cst_10 [2] : vector<8x1x16xf32> to vector<8x1xf32>
    %12 = vector.shape_cast %11 : vector<8x1xf32> to vector<8x1x1xf32>
    %cst_11 = arith.constant 0xFF800000 : f32
    %13 = vector.broadcast %cst_11 : f32 to vector<8x1x1xf32>
    %14 = arith.cmpf oeq, %12, %13 : vector<8x1x1xf32>
    %cst_12 = arith.constant 0.000000e+00 : f32
    %15 = vector.shape_cast %14 : vector<8x1x1xi1> to vector<8x1x1xi1>
    %16 = vector.broadcast %15 : vector<8x1x1xi1> to vector<8x1x16xi1>
    %17 = vector.broadcast %cst_12 : f32 to vector<8x1x16xf32>
    %18 = arith.select %16, %17, %10 : vector<8x1x16xi1>, vector<8x1x16xf32>
    %cst_13 = arith.constant 0.000000e+00 : f32
    %19 = vector.broadcast %cst_13 : f32 to vector<8x1x1xf32>
    %20 = arith.select %14, %19, %12 : vector<8x1x1xi1>, vector<8x1x1xf32>
    %21 = vector.broadcast %20 : vector<8x1x1xf32> to vector<8x1x16xf32>
    %22 = arith.subf %18, %21 : vector<8x1x16xf32>
    %23 = math.exp %22 : vector<8x1x16xf32>
    %cst_14 = arith.constant dense<0.000000e+00> : vector<8x1xf32>
    %24 = vector.multi_reduction <add>, %23, %cst_14 [2] : vector<8x1x16xf32> to vector<8x1xf32>
    %25 = vector.shape_cast %24 : vector<8x1xf32> to vector<8x1x1xf32>
    %26 = tpu.reciprocal %25 {approx = true} : vector<8x1x1xf32> -> vector<8x1x1xf32>
    %27 = vector.broadcast %26 : vector<8x1x1xf32> to vector<8x1x16xf32>
    %28 = arith.mulf %23, %27 : vector<8x1x16xf32>
    "tpu.trace_start"() <{level = 10 : i32, message = "bqk,bkd->bqd"}> : () -> ()
    %cst_15 = arith.constant dense<0.000000e+00> : vector<8x1x128xf32>
    %29 = tpu.matmul %28, %0, %cst_15 {dimension_numbers = #tpu.dot_dimension_numbers<[2], [1], [1], [2], [0, 0, 0, 1, 1, 2], [0], [0]>} : vector<8x1x16xf32>, vector<8x16x128xf32>, vector<8x1x128xf32> -> vector<8x1x128xf32>
    "tpu.trace_stop"() : () -> ()
    %c0_16 = arith.constant 0 : index
    %c0_17 = arith.constant 0 : index
    %c0_18 = arith.constant 0 : index
    %30 = vector.load %arg4[%c0_16, %c0_17, %c0_18] : memref<8x1x128xf32, #tpu.memory_space<vmem>>, vector<8x1x128xf32>
    tpu.vector_store %arg4[%c0_16, %c0_17, %c0_18], %29 {strides = array<i32>} : memref<8x1x128xf32, #tpu.memory_space<vmem>>, vector<8x1x128xf32>,
    return
  }
  func.func @transform_0(%arg0: i32) -> (i32, i32, i32) {
    %c0_i32 = arith.constant 0 : i32
    %c0_i32_0 = arith.constant 0 : i32
    %c0_i32_1 = arith.constant 0 : i32
    return %arg0, %c0_i32, %c0_i32_0 : i32, i32, i32
  }
  func.func @transform_1(%arg0: i32) -> (i32, i32, i32) {
    %c0_i32 = arith.constant 0 : i32
    %c0_i32_0 = arith.constant 0 : i32
    %c0_i32_1 = arith.constant 0 : i32
    %c0_i32_2 = arith.constant 0 : i32
    return %c0_i32, %c0_i32_0, %c0_i32_1 : i32, i32, i32
  }
  func.func @transform_2(%arg0: i32) -> (i32, i32, i32) {
    %c0_i32 = arith.constant 0 : i32
    %c0_i32_0 = arith.constant 0 : i32
    %c0_i32_1 = arith.constant 0 : i32
    return %arg0, %c0_i32, %c0_i32_0 : i32, i32, i32
  }
  func.func @transform_3(%arg0: i32) -> (i32, i32, i32) {
    %c0_i32 = arith.constant 0 : i32
    %c0_i32_0 = arith.constant 0 : i32
    %c0_i32_1 = arith.constant 0 : i32
    return %arg0, %c0_i32, %c0_i32_0 : i32, i32, i32
  }
}

</mosaic_0001>

<bundles_post_ra>
// kernel: tpu_custom_call.1
= control target key start
LH: loop header
LB: loop body
LE: loop exit
PB: predicated region body
PF: predicated region fallthrough
CT: control target
= control target key end

     0   :  { %8 = vsyncpa [#allocation3], 0  ;;  %s2447_s0 = inlined_call_operand.hbm [shape: f32[20,16,128], index: 0, kind: input, shape index: {}]   ;;  %s2448_s1 = inlined_call_operand.vmem [shape: f32[1,1,128], index: 1, kind: input, shape index: {}]   ;;  %s2449_s2 = inlined_call_operand.vmem [shape: s8[20,1,16], index: 2, kind: input, shape index: {}]   ;;  %s2450_s3 = inlined_call_operand.hbm [shape: f32[20,1,128], index: 3, kind: output, shape index: {}]  }
   0x1   :  { %10 = vsyncpa [#allocation3 + $0x1], 0 }
   0x2   :  { %11 = vsyncpa [#allocation4], 0 }
   0x3   :  { %13 = vsyncpa [#allocation4 + $0x1], 0  ;;  %s2083_s12 = smov 0   ;;  %s2085_s13 = smov 0  }
   0x4   :  { %s2087_s14 = smov 0   ;;  %s2089_s15 = smov 0  }
   0x5 LB: > { %s2104_s16 = sadd.s32 4294967295, %s2053_s15   ;;  %s1688_s17 = sadd.s32 4294967294, %s2053_s15   ;;  %s2053_s15 = sphi %s2089_s15, %s2458_s15   ;;  %s2049_s14 = sphi %s2087_s14, %s2457_s14   ;;  %s2045_s13 = sphi %s2085_s13, %s2456_s13   ;;  %s2041_s12 = sphi %s2083_s12, %s2455_s12  }
   0x6   : > { %s2108_s18 = sadd.s32 1, %s2053_s15   ;;  %s26_s19 = sadd.s32 1, %s2049_s14 }
   0x7   : > { %s23_s20 = ssub.s32 %s2053_s15, %s2108_s18  ;;  %p33_p0 = scmp.ne.s32.totalorder %s2049_s14, %s2045_s13 }
   0x8   : > { %p24_p1 = scmp.eq.s32.totalorder %s23_s20, 0  ;;  %p34_p2 = scmp.eq.s32.totalorder %s2053_s15, 0 }
   0x9   : > { %p39_p3 = scmp.ne.s32.totalorder %s2045_s13, %s2041_s12  ;;  %p40_p4 = scmp.eq.s32.totalorder %s2104_s16, 0 }
   0xa   : > { %s2120_s21 = scalar_select %p24_p1, %s2049_s14, %s26_s19  }
   0xb   : > { %p35_p5 = por %p34_p2, %p33_p0  ;;  %p2122_p6 = por %p40_p4, %p39_p3 }
   0xc   : > { %p110_p7 = scmp.eq.s32.totalorder %s2104_s16, 2  ;;  %p116_p8 = scmp.eq.s32.totalorder %s1688_s17, 2 }
   0xd   : > { %p1690_p11 = scmp.ge.s32.totalorder %s2053_s15, 3 }
   0xe   : > { %p2127_p9 = por %p110_p7, %p33_p0  ;;  %p2131_p10 = por %p116_p8, %p39_p3 }
   0xf   : > { %135 = sbr.rel (%p1690_p11) target bundleno = 52 (0x34), region = 20 }
  0x10   : > { %s2453_s24 = scalar_select %p2131_p10, 1, 0 }
  0x14   : > { %138 = sbr.rel (!%p35_p5) target bundleno = 52 (0x34), region = 24  ;;  %s139_s25 = sand.u32 (%p35_p5), 1, %s2049_s14  }
  0x15   : > { %s1692_s26 = sshll.u32 (%p35_p5), %s2053_s15, 3  ;;  %s1691_s27 = sshll.u32 (%p35_p5), %s139_s25, 7 }
  0x16   : > { %s145_s28 = ssub.s32 (%p35_p5), 20, %s1692_s26  ;;  %s2141_s4 = scalar_lea.sflag (%p35_p5), [#allocation3], %s139_s25 }
  0x17   : > { %p146_p12 = scmp.lt.s32.totalorder (%p35_p5), %s145_s28, 8  ;;  %s143_s5 = scalar_lea.vmem (%p35_p5), [#allocation2], %s1691_s27 }
  0x19   : > { %s2460_s28 = smov (!%p146_p12, %s145_s28), 8 }
  0x1a   : > { %s2138_s29 = sshll.u32 %s2460_s28, 8 }
  0x1b   : > { %s151_s30 = ssub.s32 2048, %s2138_s29 }
  0x1c   : > { %152 = vsyncadd %s2141_s4, %s151_s30  ;;  %p1695_p13 = scmp.ne.s32.totalorder %s2138_s29, 0  ;;  %s1722_s6 = sshll.u32 %s2053_s15, 11 }
  0x1d   : > { %s2149_s9 = scalar_lea.hbm %s2447_s0, %s1722_s6  ;;  %s159_s10 = sshll.u32 %s143_s5, 4  ;;  %s2151_s10 = int_to_ptr.vmem [resolvable:$true] %s159_s10 }
  0x1e   : > { %s1963_s11 = scalar_lea.hbm %s2149_s9, %s2138_s29  ;;  %s1967_s20 = scalar_lea.hbm %s2447_s0, 5120 }
  0x1f   : > { %p1964_p0 = scmp.ne.s32.totalorder %s2149_s9, %s1963_s11  ;;  %p1968_p3 = scmp.lt.s32.totalorder %s2149_s9, %s2447_s0 }
  0x20   : > { %p1969_p4 = scmp.lt.s32.totalorder %s1967_s20, %s1963_s11 }
  0x21   : > { %p1965_p1 = pnand %p1964_p0, %p1695_p13 }
  0x22   : > { %p1970_p5 = por %p1969_p4, %p1968_p3 }
  0x23   : > { %p1966_p2 = pneg %p1965_p1 }
  0x25   : > { %p1971_p7 = pnand %p1970_p5, %p1966_p2 }
  0x27   : > { %1974 = shalt.err (!%p1971_p7)
}
  0x28   : > { %s1975_s27 = scalar_lea.vmem %s2151_s10, %s2138_s29  ;;  %s2055_s28 = smov [#allocation2]  }
  0x29   : > { %p1976_p8 = scmp.ne.s32.totalorder %s2151_s10, %s1975_s27  ;;  %s1979_s30 = sshll.u32 %s2055_s28, 4  ;;  %s1980_s30 = int_to_ptr.vmem [resolvable:$false] %s1979_s30 }
  0x2a   : > { %s1981_s5 = scalar_lea.vmem %s1980_s30, 4096  ;;  %p1982_p0 = scmp.lt.s32.totalorder %s2151_s10, %s1980_s30 }
  0x2b   : > { %p1977_p11 = pnand %p1976_p8, %p1695_p13  ;;  %p1983_p1 = scmp.lt.s32.totalorder %s1981_s5, %s1975_s27 }
  0x2d   : > { %p1978_p12 = pneg %p1977_p11  ;;  %p1984_p10 = por %p1983_p1, %p1982_p0 }
  0x2f   : > { %p1985_p3 = pnand %p1984_p10, %p1978_p12 }
  0x31   : > { %1988 = shalt.err (!%p1985_p3)
}
  0x32   : > { %s2056_s6 = smov 128   ;;  %s2057_s7 = smov 8  }
  0x33   : > { %165 = dma.hbm_to_vmem [thread:$0]  (%p1695_p13), %s2149_s9, %s2138_s29, %s2151_s10, %s2141_s4, %s2056_s6, %s2056_s6, %s2057_s7  }
  0x34 PF: > { %p1701_p2 = scmp.ge.s32.totalorder %s2053_s15, 1  ;;  %p183_p4 = scmp.lt.s32.totalorder %s2053_s15, 4 }
  0x36   : > { %p184_p5 = pnand %p1701_p2, %p183_p4 }
  0x37   : > { %s2180_s8 = sand.u32 (!%p184_p5), 1, %s2045_s13  }
  0x38   : > { %187 = sbr.rel (%p184_p5) target bundleno = 827 (0x33b), region = 32  ;;  %s1702_s11 = sshll.u32 (!%p184_p5), %s2180_s8, 7 }
  0x39   : > { %s190_s17 = scalar_lea.sflag (!%p184_p5), [#allocation3], %s2180_s8  ;;  %s2184_s19 = scalar_lea.vmem (!%p184_p5), [#allocation2], %s1702_s11 }
  0x3d   : > { %2032 = dma.done.wait (%p2122_p6), %s190_s17, 2048  }
  0x3e   : > { %2034 = vsyncadd (%p2122_p6), %s190_s17, 4294965248  ;;  %v2058_v0 = vmov 0.0   ;;  %vm2059_vm0 = vmmov 0   ;;  %v249_v1 = vld [vmem:[%s2184_s19 + $0x8] sm:$0xff]  ;;  %v2198_v2 = vld [vmem:[%s2184_s19 + $0x18] sm:$0xff]  ;;  %s2292_s4 = sshll.u32 %s2104_s16, 3 }
  0x3f   : > { %1774 = vmatprep.subr.mxu0 %v2058_v0  ;;  %1781 = vmatprep.subr.mxu1 %v2058_v0  ;;  %v248_v3 = vld [vmem:[%s2184_s19] sm:$0xff]  ;;  %v250_v4 = vld [vmem:[%s2184_s19 + $0x10] sm:$0xff]  ;;  %v2211_v6 = vld [vmem:[%s2184_s19 + $0x28] sm:$0xff]  ;;  %p235_p6 = scmp.lt.s32.totalorder %s2292_s4, 19  ;;  %vm865_vm2 = vcmask 122880   ;;  %s1703_s26 = sshll.u32 %s2180_s8, 3 }
  0x40   : > { %1778 = vmatprep.mubr.msk.f32.mxu0 %vm2059_vm0, %v2058_v0  ;;  %1785 = vmatprep.mubr.msk.f32.mxu1 %vm2059_vm0, %v2058_v0  ;;  %v264_v5 = vld [vmem:[%s2448_s1] sm:$0x1]  ;;  %v2214_v7 = vld [vmem:[%s2184_s19 + $0x38] sm:$0xff]  ;;  %v2224_v9 = vld [vmem:[%s2184_s19 + $0x30] sm:$0xff]  ;;  %s2376_s27 = scalar_lea.vmem [#allocation5], %s1703_s26  ;;  %s1588_s28 = scalar_lea.sflag [#allocation4], %s2180_s8 }
  0x41   : > { %1775 = vmatpush3.xpose.msra.mxu0 %v249_v1  ;;  %1782 = vmatpush3.xpose.msra.mxu1 %v2198_v2  ;;  %v2221_v8 = vld [vmem:[%s2184_s19 + $0x20] sm:$0xff]  ;;  %v2235_v10 = vld [vmem:[%s2184_s19 + $0x48] sm:$0xff]  ;;  %v2238_v11 = vld [vmem:[%s2184_s19 + $0x58] sm:$0xff]  ;;  %s236_s9 = scalar_select %p235_p6, %s2292_s4, 19 }
  0x42   : > { %1776 = vmatprep.subr.mxu0 %v2058_v0  ;;  %1783 = vmatprep.subr.mxu1 %v2058_v0  ;;  %v2245_v12 = vld [vmem:[%s2184_s19 + $0x40] sm:$0xff]  ;;  %v2248_v13 = vld [vmem:[%s2184_s19 + $0x50] sm:$0xff]  ;;  %v2259_v14 = vld [vmem:[%s2184_s19 + $0x68] sm:$0xff]  ;;  %s1596_s30 = ssub.s32 (%p2127_p9), 20, %s2292_s4 }
  0x43   : > { %v2262_v15 = vld [vmem:[%s2184_s19 + $0x78] sm:$0xff]  ;;  %v2269_v16 = vld [vmem:[%s2184_s19 + $0x60] sm:$0xff]  ;;  %v2272_v17 = vld [vmem:[%s2184_s19 + $0x70] sm:$0xff]  ;;  %s2299_s25 = scalar_lea.vmem %s2449_s2, %s236_s9  ;;  %p1597_p10 = scmp.lt.s32.totalorder (%p2127_p9), %s1596_s30, 8 }
  0x44   : > { %v825_v18 = vld [vmem:[%s2299_s25] sm:$0x1]  ;;  %v826_v19 = vld [vmem:[%s2299_s25 + $0x1] sm:$0x1]  ;;  %v827_v23 = vld [vmem:[%s2299_s25 + $0x2] sm:$0x1] }
  0x45   : > { %1777 = vmatpush3.xpose.msra.mxu0 %v248_v3  ;;  %1784 = vmatpush3.xpose.msra.mxu1 %v250_v4  ;;  %v833_v20 = vunpack.c.0.s8 %v825_v18  ;;  %v834_v21 = vunpack.c.0.s8 %v826_v19  ;;  %v828_v25 = vld [vmem:[%s2299_s25 + $0x3] sm:$0x1]  ;;  %v835_v26 = vunpack.c.0.s8 %v827_v23  ;;  %v829_v35 = vld [vmem:[%s2299_s25 + $0x4] sm:$0x1]  ;;  %v830_v37 = vld [vmem:[%s2299_s25 + $0x5] sm:$0x1] }
  0x46   : > { %1788 = vmatprep.subr.mxu0 %v2058_v0  ;;  %1795 = vmatprep.subr.mxu1 %v2058_v0  ;;  %v836_v29 = vunpack.c.0.s8 %v828_v25  ;;  %v837_v39 = vunpack.c.0.s8 %v829_v35  ;;  %v838_v41 = vunpack.c.0.s8 %v830_v37  ;;  %v831_v51 = vld [vmem:[%s2299_s25 + $0x6] sm:$0x1]  ;;  %v832_v52 = vld [vmem:[%s2299_s25 + $0x7] sm:$0x1] }
  0x47   : > { %v841_v22 = vcvt.s32.f32 %v833_v20  ;;  %v842_v24 = vcvt.s32.f32 %v834_v21  ;;  %v843_v34 = vcvt.s32.f32 %v835_v26  ;;  %v839_v54 = vunpack.c.0.s8 %v831_v51 }
  0x48   : > { %1779 = vmatmul.mubr.f32.vlgmr.msra.gmra.mxu0 %v264_v5  ;;  %1786 = vmatmul.mubr.f32.vlgmr.msra.gmra.mxu1 %v264_v5  ;;  %v844_v38 = vcvt.s32.f32 %v836_v29  ;;  %v845_v45 = vcvt.s32.f32 %v837_v39  ;;  %v846_v49 = vcvt.s32.f32 %v838_v41  ;;  %v840_v55 = vunpack.c.0.s8 %v832_v52 }
  0x49   : > { %1789 = vmatpush3.xpose.msra.mxu0 %v2211_v6  ;;  %1796 = vmatpush3.xpose.msra.mxu1 %v2214_v7  ;;  %vm849_vm1 = vcmp.ne.f32.partialorder %v841_v22, 0.0  ;;  %vm850_vm3 = vcmp.ne.f32.partialorder %v842_v24, 0.0  ;;  %vm851_vm4 = vcmp.ne.f32.partialorder %v843_v34, 0.0 }
  0x4a   : > { %1790 = vmatprep.subr.mxu0 %v2058_v0  ;;  %1797 = vmatprep.subr.mxu1 %v2058_v0  ;;  %vm852_vm5 = vcmp.ne.f32.partialorder %v844_v38, 0.0  ;;  %vm853_vm6 = vcmp.ne.f32.partialorder %v845_v45, 0.0  ;;  %vm854_vm7 = vcmp.ne.f32.partialorder %v846_v49, 0.0 }
  0x4b   : > { %1792 = vmatprep.mubr.msk.f32.mxu0 %vm2059_vm0, %v2058_v0  ;;  %1799 = vmatprep.mubr.msk.f32.mxu1 %vm2059_vm0, %v2058_v0 }
  0x4d   : > { %1791 = vmatpush3.xpose.msra.mxu0 %v2221_v8  ;;  %1798 = vmatpush3.xpose.msra.mxu1 %v2224_v9 }
  0x4e   : > { %1802 = vmatprep.subr.mxu0 %v2058_v0  ;;  %1809 = vmatprep.subr.mxu1 %v2058_v0 }
  0x50   : > { %1793 = vmatmul.mubr.f32.vlgmr.msra.gmra.mxu0 %v264_v5  ;;  %1800 = vmatmul.mubr.f32.vlgmr.msra.gmra.mxu1 %v264_v5 }
  0x51   : > { %1803 = vmatpush3.xpose.msra.mxu0 %v2235_v10  ;;  %1810 = vmatpush3.xpose.msra.mxu1 %v2238_v11 }
  0x52   : > { %1804 = vmatprep.subr.mxu0 %v2058_v0  ;;  %1811 = vmatprep.subr.mxu1 %v2058_v0 }
  0x53   : > { %1806 = vmatprep.mubr.msk.f32.mxu0 %vm2059_vm0, %v2058_v0  ;;  %1813 = vmatprep.mubr.msk.f32.mxu1 %vm2059_vm0, %v2058_v0 }
  0x55   : > { %1805 = vmatpush3.xpose.msra.mxu0 %v2245_v12  ;;  %1812 = vmatpush3.xpose.msra.mxu1 %v2248_v13 }
  0x56   : > { %1816 = vmatprep.subr.mxu0 %v2058_v0  ;;  %1823 = vmatprep.subr.mxu1 %v2058_v0 }
  0x58   : > { %1807 = vmatmul.mubr.f32.vlgmr.msra.gmra.mxu0 %v264_v5  ;;  %1814 = vmatmul.mubr.f32.vlgmr.msra.gmra.mxu1 %v264_v5 }
  0x59   : > { %1817 = vmatpush3.xpose.msra.mxu0 %v2259_v14  ;;  %1824 = vmatpush3.xpose.msra.mxu1 %v2262_v15 }
  0x5a   : > { %1818 = vmatprep.subr.mxu0 %v2058_v0  ;;  %1825 = vmatprep.subr.mxu1 %v2058_v0 }
  0x5b   : > { %1820 = vmatprep.mubr.msk.f32.mxu0 %vm2059_vm0, %v2058_v0  ;;  %1827 = vmatprep.mubr.msk.f32.mxu1 %vm2059_vm0, %v2058_v0 }
  0x5d   : > { %1819 = vmatpush3.xpose.msra.mxu0 %v2269_v16  ;;  %1826 = vmatpush3.xpose.msra.mxu1 %v2272_v17 }
  0x5e   : > { %1830 = vmatprep.subr.mxu0 %v2058_v0  ;;  %1837 = vmatprep.subr.mxu1 %v2058_v0 }
  0x60   : > { %1821 = vmatmul.mubr.f32.vlgmr.msra.gmra.mxu0 %v264_v5  ;;  %1828 = vmatmul.mubr.f32.vlgmr.msra.gmra.mxu1 %v264_v5 }
  0x61   : > { %1831 = vmatpush3.msra.mxu0 %v249_v1  ;;  %1834 = vmatprep.mubr.msk.f32.mxu0 %vm2059_vm0, %v2058_v0  ;;  %v847_v1 = vcvt.s32.f32 %v839_v54 }
  0x62   : > { %1832 = vmatprep.subr.mxu0 %v2058_v0  ;;  %1838 = vmatpush3.msra.mxu1 %v2198_v2  ;;  %v848_v2 = vcvt.s32.f32 %v840_v55 }
  0x63   : > { %1833 = vmatpush3.msra.mxu0 %v248_v3  ;;  %1839 = vmatprep.subr.mxu1 %v2058_v0  ;;  %vm855_vm8 = vcmp.ne.f32.partialorder %v847_v1, 0.0 }
  0x64   : > { %1840 = vmatpush3.msra.mxu1 %v250_v4  ;;  %1841 = vmatprep.mubr.msk.f32.mxu1 %vm2059_vm0, %v2058_v0  ;;  %vm856_vm9 = vcmp.ne.f32.partialorder %v848_v2, 0.0 }
  0x65   : > { %1844 = vmatprep.subr.mxu0 %v2058_v0  ;;  %1851 = vmatprep.subr.mxu1 %v2058_v0 }
 0x108   : > { %v331_v27 = vpop.f32.mrf.mxu0  ;;  %v401_v28 = vpop.f32.mrf.mxu1 }
 0x109   : > { %v857_v30 = vsel %vm849_vm1, -inf, %v331_v27  ;;  %v858_v36 = vsel %vm850_vm3, -inf, %v401_v28 }
 0x10a   : > { %v1780_v31 = vpop.f32.mrf.mxu0  ;;  %v1787_v32 = vpop.f32.mrf.mxu1  ;;  %v866_v33 = vsel %vm865_vm2, %v857_v30, -inf  ;;  %v869_v40 = vsel %vm865_vm2, %v858_v36, -inf }
 0x10b   : > { %867 = vmax.xlane.f32.xlu0 %v866_v33 }
 0x10f   : > { %870 = vmax.xlane.f32.xlu0 %v869_v40 }
 0x110   : > { %v471_v42 = vpop.f32.mrf.mxu0  ;;  %v541_v43 = vpop.f32.mrf.mxu1 }
 0x111   : > { %v859_v44 = vsel %vm851_vm4, -inf, %v471_v42  ;;  %v860_v50 = vsel %vm852_vm5, -inf, %v541_v43  ;;  %vm994_vm4 = vcmask 130048  }
 0x112   : > { %v1794_v46 = vpop.f32.mrf.mxu0  ;;  %v1801_v47 = vpop.f32.mrf.mxu1  ;;  %v872_v48 = vsel %vm865_vm2, %v859_v44, -inf  ;;  %v875_v53 = vsel %vm865_vm2, %v860_v50, -inf }
 0x113   : > { %873 = vmax.xlane.f32.xlu1 %v872_v48 }
 0x117   : > { %876 = vmax.xlane.f32.xlu1 %v875_v53 }
 0x118   : > { %v611_v56 = vpop.f32.mrf.mxu0  ;;  %v681_v57 = vpop.f32.mrf.mxu1 }
 0x119   : > { %v861_v58 = vsel %vm853_vm6, -inf, %v611_v56  ;;  %v862_v59 = vsel %vm854_vm7, -inf, %v681_v57 }
 0x11a   : > { %v1808_v60 = vpop.f32.mrf.mxu0  ;;  %v1815_v61 = vpop.f32.mrf.mxu1  ;;  %v881_v62 = vsel %vm865_vm2, %v862_v59, -inf  ;;  %v878_v63 = vsel %vm865_vm2, %v861_v58, -inf }
 0x11b   : > { %882 = vmax.xlane.f32.xlu1 %v881_v62  ;;  %879 = vmax.xlane.f32.xlu0 %v878_v63 }
 0x120   : > { %v751_v3 = vpop.f32.mrf.mxu0  ;;  %v821_v4 = vpop.f32.mrf.mxu1 }
 0x121   : > { %v863_v5 = vsel %vm855_vm8, -inf, %v751_v3  ;;  %v864_v18 = vsel %vm856_vm9, -inf, %v821_v4 }
 0x122   : > { %v1822_v19 = vpop.f32.mrf.mxu0  ;;  %v1829_v20 = vpop.f32.mrf.mxu1  ;;  %v887_v21 = vsel %vm865_vm2, %v864_v18, -inf  ;;  %v884_v22 = vsel %vm865_vm2, %v863_v5, -inf }
 0x123   : > { %888 = vmax.xlane.f32.xlu1 %v887_v21  ;;  %885 = vmax.xlane.f32.xlu0 %v884_v22 }
 0x194   : > { %v868_v23 = vpop.xlane.xlu0 %867 }
 0x195   : > { %vm890_vm10 = vcmp.eq.f32.partialorder %v868_v23, -inf }
 0x196   : > { %v914_v24 = vsel %vm890_vm10, 0.0, %v857_v30  ;;  %v922_v25 = vsel %vm890_vm10, 0.0, %v868_v23 }
 0x197   : > { %v930_v26 = vsub.f32 %v914_v24, %v922_v25 }
 0x198   : > { %v871_v27 = vpop.xlane.xlu0 %870 }
 0x199   : > { %v938_v28 = vmul.f32 1.442695, %v930_v26  ;;  %vm891_vm11 = vcmp.eq.f32.partialorder %v871_v27, -inf }
 0x19a   : > { %v915_v29 = vsel %vm891_vm11, 0.0, %v858_v36  ;;  %v923_v31 = vsel %vm891_vm11, 0.0, %v871_v27 }
 0x19b   : > { %1931 = vpow2.f32 %v938_v28  ;;  %v931_v32 = vsub.f32 %v915_v29, %v923_v31 }
 0x19c   : > { %v874_v33 = vpop.xlane.xlu1 %873 }
 0x19d   : > { %v940_v34 = vmul.f32 1.442695, %v931_v32  ;;  %vm892_vm12 = vcmp.eq.f32.partialorder %v874_v33, -inf }
 0x19e   : > { %v916_v35 = vsel %vm892_vm12, 0.0, %v859_v44  ;;  %v924_v37 = vsel %vm892_vm12, 0.0, %v874_v33 }
 0x19f   : > { %1933 = vpow2.f32 %v940_v34  ;;  %v932_v38 = vsub.f32 %v916_v35, %v924_v37 }
 0x1a0   : > { %v877_v39 = vpop.xlane.xlu1 %876 }
 0x1a1   : > { %v942_v40 = vmul.f32 1.442695, %v932_v38  ;;  %vm893_vm13 = vcmp.eq.f32.partialorder %v877_v39, -inf }
 0x1a2   : > { %v917_v30 = vsel %vm893_vm13, 0.0, %v860_v50  ;;  %v925_v41 = vsel %vm893_vm13, 0.0, %v877_v39 }
 0x1a3   : > { %1935 = vpow2.f32 %v942_v40  ;;  %v933_v42 = vsub.f32 %v917_v30, %v925_v41 }
 0x1a4   : > { %v883_v43 = vpop.xlane.xlu1 %882  ;;  %v880_v45 = vpop.xlane.xlu0 %879 }
 0x1a5   : > { %v944_v36 = vmul.f32 1.442695, %v933_v42  ;;  %vm895_vm14 = vcmp.eq.f32.partialorder %v883_v43, -inf  ;;  %vm894_vm15 = vcmp.eq.f32.partialorder %v880_v45, -inf }
 0x1a6   : > { %v919_v46 = vsel %vm895_vm14, 0.0, %v862_v59  ;;  %v927_v47 = vsel %vm895_vm14, 0.0, %v883_v43  ;;  %v918_v48 = vsel %vm894_vm15, 0.0, %v861_v58  ;;  %v926_v49 = vsel %vm894_vm15, 0.0, %v880_v45 }
 0x1a7   : > { %1937 = vpow2.f32 %v944_v36  ;;  %v935_v44 = vsub.f32 %v919_v46, %v927_v47  ;;  %v934_v51 = vsub.f32 %v918_v48, %v926_v49 }
 0x1a8   : > { %v1932_v52 = vpop.eup %1931 }
 0x1a9   : > { %v948_v53 = vmul.f32 1.442695, %v935_v44  ;;  %v946_v54 = vmul.f32 1.442695, %v934_v51  ;;  %v954_v50 = vsel %vm865_vm2, %v1932_v52, 0.0 }
 0x1aa   : > { %955 = vadd.xlane.f32.xlu0 %v954_v50 }
 0x1ab   : > { %1939 = vpow2.f32 %v948_v53 }
 0x1ac   : > { %v1934_v55 = vpop.eup %1933  ;;  %1941 = vpow2.f32 %v946_v54  ;;  %v889_v56 = vpop.xlane.xlu1 %888 }
 0x1ad   : > { %v886_v57 = vpop.xlane.xlu0 %885  ;;  %vm897_vm1 = vcmp.eq.f32.partialorder %v889_v56, -inf  ;;  %v957_v59 = vsel %vm865_vm2, %v1934_v55, 0.0 }
 0x1ae   : > { %vm896_vm3 = vcmp.eq.f32.partialorder %v886_v57, -inf  ;;  %v921_v58 = vsel %vm897_vm1, 0.0, %v864_v18  ;;  %v929_v60 = vsel %vm897_vm1, 0.0, %v889_v56  ;;  %958 = vadd.xlane.f32.xlu1 %v957_v59 }
 0x1af   : > { %v920_v61 = vsel %vm896_vm3, 0.0, %v863_v5  ;;  %v928_v62 = vsel %vm896_vm3, 0.0, %v886_v57  ;;  %v937_v63 = vsub.f32 %v921_v58, %v929_v60 }
 0x1b0   : > { %v936_v1 = vsub.f32 %v920_v61, %v928_v62  ;;  %v1936_v2 = vpop.eup %1935 }
 0x1b1   : > { %v952_v3 = vmul.f32 1.442695, %v937_v63  ;;  %v960_v19 = vsel %vm865_vm2, %v1936_v2, 0.0 }
 0x1b2   : > { %v950_v4 = vmul.f32 1.442695, %v936_v1  ;;  %961 = vadd.xlane.f32.xlu0 %v960_v19 }
 0x1b3   : > { %1943 = vpow2.f32 %v952_v3 }
 0x1b4   : > { %v1938_v20 = vpop.eup %1937  ;;  %1945 = vpow2.f32 %v950_v4 }
 0x1b5   : > { %v963_v21 = vsel %vm865_vm2, %v1938_v20, 0.0 }
 0x1b6   : > { %964 = vadd.xlane.f32.xlu1 %v963_v21 }
 0x1b8   : > { %v1940_v22 = vpop.eup %1939 }
 0x1b9   : > { %v1942_v18 = vpop.eup %1941  ;;  %v969_v5 = vsel %vm865_vm2, %v1940_v22, 0.0 }
 0x1ba   : > { %970 = vadd.xlane.f32.xlu1 %v969_v5  ;;  %v966_v23 = vsel %vm865_vm2, %v1942_v18, 0.0 }
 0x1bb   : > { %967 = vadd.xlane.f32.xlu0 %v966_v23 }
 0x1c0   : > { %v2323_v24 = vpop.eup %1943 }
 0x1c1   : > { %v2325_v25 = vpop.eup %1945  ;;  %v975_v26 = vsel %vm865_vm2, %v2323_v24, 0.0 }
 0x1c2   : > { %976 = vadd.xlane.f32.xlu1 %v975_v26  ;;  %v972_v27 = vsel %vm865_vm2, %v2325_v25, 0.0 }
 0x1c3   : > { %973 = vadd.xlane.f32.xlu0 %v972_v27 }
 0x233   : > { %v956_v28 = vpop.xlane.xlu0 %955 }
 0x234   : > { %1947 = vrcp.f32 %v956_v28 }
 0x237   : > { %v959_v29 = vpop.xlane.xlu1 %958 }
 0x238   : > { %1949 = vrcp.f32 %v959_v29 }
 0x23b   : > { %v962_v31 = vpop.xlane.xlu0 %961 }
 0x23c   : > { %1951 = vrcp.f32 %v962_v31 }
 0x23f   : > { %v965_v32 = vpop.xlane.xlu1 %964 }
 0x240   : > { %1953 = vrcp.f32 %v965_v32 }
 0x241   : > { %v1948_v33 = vpop.eup %1947 }
 0x242   : > { %v986_v34 = vmul.f32 %v1948_v33, %v1932_v52 }
 0x243   : > { %v971_v35 = vpop.xlane.xlu1 %970 }
 0x244   : > { %1955 = vrcp.f32 %v971_v35  ;;  %v968_v37 = vpop.xlane.xlu0 %967  ;;  %1835 = vmatmul.mubr.msk.f32.vlgmr.msra.gmra.mxu0 %vm994_vm4, %v986_v34 }
 0x245   : > { %v1950_v38 = vpop.eup %1949  ;;  %1957 = vrcp.f32 %v968_v37  ;;  %1845 = vmatpush3.msra.mxu0 %v2211_v6  ;;  %1848 = vmatprep.mubr.msk.f32.mxu0 %vm2059_vm0, %v2058_v0 }
 0x246   : > { %v987_v39 = vmul.f32 %v1950_v38, %v1934_v55  ;;  %1846 = vmatprep.subr.mxu0 %v2058_v0 }
 0x247   : > { %1847 = vmatpush3.msra.mxu0 %v2221_v8 }
 0x248   : > { %1842 = vmatmul.mubr.msk.f32.vlgmr.msra.gmra.mxu1 %vm994_vm4, %v987_v39  ;;  %1858 = vmatprep.subr.mxu0 %v2058_v0 }
 0x249   : > { %v1952_v40 = vpop.eup %1951  ;;  %1852 = vmatpush3.msra.mxu1 %v2214_v7  ;;  %1855 = vmatprep.mubr.msk.f32.mxu1 %vm2059_vm0, %v2058_v0 }
 0x24a   : > { %v988_v30 = vmul.f32 %v1952_v40, %v1936_v2  ;;  %1853 = vmatprep.subr.mxu1 %v2058_v0 }
 0x24b   : > { %v977_v6 = vpop.xlane.xlu1 %976  ;;  %1854 = vmatpush3.msra.mxu1 %v2224_v9 }
 0x24c   : > { %1959 = vrcp.f32 %v977_v6  ;;  %v974_v41 = vpop.xlane.xlu0 %973  ;;  %1849 = vmatmul.mubr.msk.f32.vlgmr.msra.gmra.mxu0 %vm994_vm4, %v988_v30  ;;  %1865 = vmatprep.subr.mxu1 %v2058_v0 }
 0x24d   : > { %v1954_v8 = vpop.eup %1953  ;;  %1961 = vrcp.f32 %v974_v41  ;;  %1859 = vmatpush3.msra.mxu0 %v2235_v10  ;;  %1862 = vmatprep.mubr.msk.f32.mxu0 %vm2059_vm0, %v2058_v0 }
 0x24e   : > { %v989_v7 = vmul.f32 %v1954_v8, %v1938_v20  ;;  %1860 = vmatprep.subr.mxu0 %v2058_v0 }
 0x24f   : > { %1861 = vmatpush3.msra.mxu0 %v2245_v12 }
 0x250   : > { %1856 = vmatmul.mubr.msk.f32.vlgmr.msra.gmra.mxu1 %vm994_vm4, %v989_v7  ;;  %1872 = vmatprep.subr.mxu0 %v2058_v0 }
 0x251   : > { %v1956_v9 = vpop.eup %1955  ;;  %1866 = vmatpush3.msra.mxu1 %v2238_v11  ;;  %1869 = vmatprep.mubr.msk.f32.mxu1 %vm2059_vm0, %v2058_v0 }
 0x252   : > { %v1958_v42 = vpop.eup %1957  ;;  %1867 = vmatprep.subr.mxu1 %v2058_v0  ;;  %v991_v10 = vmul.f32 %v1956_v9, %v1940_v22 }
 0x253   : > { %1868 = vmatpush3.msra.mxu1 %v2248_v13  ;;  %v990_v43 = vmul.f32 %v1958_v42, %v1942_v18 }
 0x254   : > { %1870 = vmatmul.mubr.msk.f32.vlgmr.msra.gmra.mxu1 %vm994_vm4, %v991_v10  ;;  %1879 = vmatprep.subr.mxu1 %v2058_v0 }
 0x255   : > { %1863 = vmatmul.mubr.msk.f32.vlgmr.msra.gmra.mxu0 %vm994_vm4, %v990_v43  ;;  %1880 = vmatpush3.msra.mxu1 %v2262_v15 }
 0x256   : > { %1873 = vmatpush3.msra.mxu0 %v2259_v14  ;;  %1881 = vmatprep.subr.mxu1 %v2058_v0 }
 0x257   : > { %1874 = vmatprep.subr.mxu0 %v2058_v0  ;;  %1882 = vmatpush3.msra.mxu1 %v2272_v17 }
 0x258   : > { %1875 = vmatpush3.msra.mxu0 %v2269_v16  ;;  %1876 = vmatprep.mubr.msk.f32.mxu0 %vm2059_vm0, %v2058_v0 }
 0x259   : > { %v1960_v11 = vpop.eup %1959  ;;  %1883 = vmatprep.mubr.msk.f32.mxu1 %vm2059_vm0, %v2058_v0 }
 0x25a   : > { %v1962_v12 = vpop.eup %1961  ;;  %v993_v13 = vmul.f32 %v1960_v11, %v2323_v24 }
 0x25b   : > { %v992_v14 = vmul.f32 %v1962_v12, %v2325_v25 }
 0x25c   : > { %1884 = vmatmul.mubr.msk.f32.vlgmr.msra.gmra.mxu1 %vm994_vm4, %v993_v13 }
 0x25d   : > { %1877 = vmatmul.mubr.msk.f32.vlgmr.msra.gmra.mxu0 %vm994_vm4, %v992_v14 }
 0x304   : > { %v1064_v15 = vpop.f32.mrf.mxu0 }
 0x305   : > { %1579 = vst [vmem:[%s2376_s27] sm:$0x1] %v1064_v15 }
 0x306   : > { %v1836_v0 = vpop.f32.mrf.mxu0 }
 0x308   : > { %v1137_v16 = vpop.f32.mrf.mxu1 }
 0x309   : > { %1580 = vst [vmem:[%s2376_s27 + $0x1] sm:$0x1] %v1137_v16 }
 0x30a   : > { %v1843_v17 = vpop.f32.mrf.mxu1 }
 0x30c   : > { %v1210_v45 = vpop.f32.mrf.mxu0 }
 0x30d   : > { %1581 = vst [vmem:[%s2376_s27 + $0x2] sm:$0x1] %v1210_v45 }
 0x30e   : > { %v1850_v36 = vpop.f32.mrf.mxu0 }
 0x310   : > { %v1283_v46 = vpop.f32.mrf.mxu1 }
 0x311   : > { %1582 = vst [vmem:[%s2376_s27 + $0x3] sm:$0x1] %v1283_v46 }
 0x312   : > { %v1857_v47 = vpop.f32.mrf.mxu1 }
 0x314   : > { %v1429_v48 = vpop.f32.mrf.mxu1 }
 0x315   : > { %v1356_v49 = vpop.f32.mrf.mxu0  ;;  %1584 = vst [vmem:[%s2376_s27 + $0x5] sm:$0x1] %v1429_v48 }
 0x316   : > { %1583 = vst [vmem:[%s2376_s27 + $0x4] sm:$0x1] %v1356_v49  ;;  %v1871_v44 = vpop.f32.mrf.mxu1 }
 0x317   : > { %v1864_v51 = vpop.f32.mrf.mxu0 }
 0x31b   : > { %1594 = sbr.rel (!%p2127_p9) target bundleno = 827 (0x33b), region = 40 }
 0x31c   : > { %v1575_v52 = vpop.f32.mrf.mxu1 }
 0x31d   : > { %v1502_v53 = vpop.f32.mrf.mxu0  ;;  %1586 = vst [vmem:[%s2376_s27 + $0x7] sm:$0x1] %v1575_v52 }
 0x31e   : > { %1585 = vst [vmem:[%s2376_s27 + $0x6] sm:$0x1] %v1502_v53  ;;  %v1885_v54 = vpop.f32.mrf.mxu1 }
 0x31f   : > { %v1878_v50 = vpop.f32.mrf.mxu0 }
 0x320   : > { %s2462_s30 = smov (!%p1597_p10, %s1596_s30), 8 }
 0x321   : > { %s2390_s5 = sshll.u32 %s2462_s30, 4 }
 0x322   : > { %s1601_s6 = ssub.s32 128, %s2390_s5 }
 0x323   : > { %1602 = vsyncadd %s1588_s28, %s1601_s6  ;;  %p1716_p13 = scmp.ne.s32.totalorder %s2390_s5, 0  ;;  %s1725_s7 = sshll.u32 %s2104_s16, 7 }
 0x324   : > { %s2400_s17 = scalar_lea.hbm %s2450_s3, %s1725_s7  ;;  %s1606_s19 = sshll.u32 %s2376_s27, 4  ;;  %s2403_s19 = int_to_ptr.vmem [resolvable:$true] %s1606_s19 }
 0x325   : > { %s1989_s22 = scalar_lea.vmem %s2403_s19, %s2390_s5  ;;  %s2060_s29 = smov [#allocation5]  }
 0x326   : > { %p1990_p9 = scmp.ne.s32.totalorder %s2403_s19, %s1989_s22  ;;  %s1993_s4 = sshll.u32 %s2060_s29, 4  ;;  %s1994_s4 = int_to_ptr.vmem [resolvable:$false] %s1993_s4 }
 0x327   : > { %s1995_s16 = scalar_lea.vmem %s1994_s4, 256  ;;  %p1996_p11 = scmp.lt.s32.totalorder %s2403_s19, %s1994_s4 }
 0x328   : > { %p1991_p7 = pnand %p1990_p9, %p1716_p13  ;;  %p1997_p12 = scmp.lt.s32.totalorder %s1995_s16, %s1989_s22 }
 0x32a   : > { %p1992_p8 = pneg %p1991_p7  ;;  %p1998_p0 = por %p1997_p12, %p1996_p11 }
 0x32c   : > { %p1999_p1 = pnand %p1998_p0, %p1992_p8 }
 0x32e   : > { %2002 = shalt.err (!%p1999_p1)
}
 0x32f   : > { %s2003_s9 = scalar_lea.hbm %s2400_s17, %s2390_s5  ;;  %s2007_s25 = scalar_lea.hbm %s2450_s3, 320 }
 0x330   : > { %p2004_p3 = scmp.ne.s32.totalorder %s2400_s17, %s2003_s9  ;;  %p2008_p5 = scmp.lt.s32.totalorder %s2400_s17, %s2450_s3 }
 0x331   : > { %p2009_p6 = scmp.lt.s32.totalorder %s2007_s25, %s2003_s9 }
 0x332   : > { %p2005_p2 = pnand %p2004_p3, %p1716_p13 }
 0x333   : > { %p2010_p10 = por %p2009_p6, %p2008_p5 }
 0x334   : > { %p2006_p4 = pneg %p2005_p2 }
 0x336   : > { %p2011_p9 = pnand %p2010_p10, %p2006_p4 }
 0x338   : > { %2014 = shalt.err (!%p2011_p9)
}
 0x339   : > { %s2061_s30 = smov 16   ;;  %s2062_s6 = smov 1  }
 0x33a   : > { %1612 = dma.vmem_to_hbm [thread:$0]  (%p1716_p13), %s2403_s19, %s2390_s5, %s2400_s17, %s1588_s28, %s2061_s30, %s2061_s30, %s2062_s6  }
 0x33b PF: > { %p1892_p7 = scmp.ge.s32.totalorder %s2053_s15, 2  ;;  %s1621_s7 = sand.u32 1, %s2041_s12  }
 0x33c   : > { %p2454_p8 = scmp.ne.s32.totalorder %s2453_s24, 0  ;;  %s1622_s23 = scalar_lea.sflag [#allocation4], %s1621_s7 }
 0x33e   : > { %p1889_p11 = pnand %p1892_p7, %p2454_p8 }
 0x340   : > { %p1890_p12 = pneg %p1889_p11 }
 0x342   : > { %2036 = dma.done.wait (%p1890_p12), %s1622_s23, 128  }
 0x343   : > { %2038 = vsyncadd (%p1890_p12), %s1622_s23, 4294967168  ;;  %p16_p0 = scmp.ge.s32.totalorder %s2108_s18, 5   ;;  %s2455_s12 = smov %s2045_s13 }
 0x344   : > { %s2456_s13 = smov %s2049_s14  ;;  %s2457_s14 = smov %s2120_s21 }
 0x345   : > { %s2458_s15 = smov %s2108_s18  ;;  %18 = sbr.rel (!%p16_p0) target bundleno = 5 (0x5), region = 80 }
 0x34a   :  { %1627 = vsyncpa [#allocation3], 1 }
 0x34b   :  { %1629 = vsyncpa [#allocation3 + $0x1], 1 }
 0x34c   :  { %1630 = vsyncpa [#allocation4], 1 }
 0x34d   :  { %1632 = vsyncpa [#allocation4 + $0x1], 1 }

</bundles_post_ra>
